<compile_context>
chip_gen: v5e
topology: v5e:2x2
jax: 0.10.0
libtpu: 0.0.40
codegen_flags: <defaults>
</compile_context>

<pallas_src>
import functools
import math

import jax
import jax.numpy as jnp
from jax.experimental import pallas as pl
from jax.experimental.pallas import tpu as pltpu

_NEG_INV_LOG2 = -1.0 / math.log(2.0)


def _round_up(n, m):
    return ((n + m - 1) // m) * m


def _is_v7x():
    try:
        return "v7" in jax.devices()[0].device_kind.lower()
    except Exception:
        return False


def _choose_hw_tile(C, HW, itemsize, max_block_bytes):
    """Lane-dense spatial tile: the full HW axis if it fits, else a multiple of 128."""
    c_rows = _round_up(max(C, 1), 8)                 # sublane padding in VMEM
    if c_rows * _round_up(HW, 128) * itemsize <= max_block_bytes:
        return HW                                    # single full-axis tile (always legal)
    lanes = max_block_bytes // (c_rows * itemsize)
    return min(HW, max(128, (lanes // 128) * 128))


def _fused_double_softplus(u, l):
    # softplus(-u) + softplus(l), fused so only ONE log is needed.
    # Both exp arguments are <= 0, so (1+e^{-|u|})(1+e^{-|l|}) is in [1, 4]: safe.
    return (jnp.maximum(-u, 0.0) + jnp.maximum(l, 0.0)
            + jnp.log((1.0 + jnp.exp(-jnp.abs(u))) * (1.0 + jnp.exp(-jnp.abs(l)))))


def _log_prob_tile(x, loc, inv_s, logc):
    """log p(x) of the unit-width bin of a logistic, stable in the tails.

    log(sigmoid(u) - sigmoid(l)) = -softplus(-u) - softplus(l) + log1p(-exp(-1/s)),
    with u = (x+.5-mu)/s and l = u - 1/s.  `logc` is the per-channel constant
    log1p(-exp(-1/s)).  3 transcendentals / element (2 exp + 1 log).
    """
    u = (x + 0.5 - loc) * inv_s
    l = u - inv_s
    return logc - _fused_double_softplus(u, l)


def _accumulate(lp, acc_ref, global_tile, *, HW, hw_tile, any_ragged):
    """Sublane-reduce a tile of log-probs into the per-lane accumulator.

    The iota/compare/where mask only exists on the ragged last tile (pl.when-gated),
    so interior tiles pay no VPU mask cost.
    """
    if any_ragged:
        full = (global_tile + 1) * hw_tile <= HW

        @pl.when(full)
        def _():
            acc_ref[...] += jnp.sum(lp, axis=0, keepdims=True)

        @pl.when(jnp.logical_not(full))
        def _():
            hw_idx = (jax.lax.broadcasted_iota(jnp.int32, lp.shape, 1)
                      + global_tile * hw_tile)
            # select (NOT multiply): garbage lanes of the partial tile may be Inf/NaN
            # after exp and must never enter the accumulation.
            acc_ref[...] += jnp.sum(jnp.where(hw_idx < HW, lp, 0.0),
                                    axis=0, keepdims=True)
    else:
        acc_ref[...] += jnp.sum(lp, axis=0, keepdims=True)


def _init_finalize(acc_ref, bits_ref, t, n_inner, *, compute_lp):
    """Shared init (t==0) and finalize (t==last) around the per-tile compute."""

    @pl.when(t == 0)
    def _():
        acc_ref[...] = jnp.zeros_like(acc_ref)

    compute_lp()

    @pl.when(t == n_inner - 1)
    def _():
        bits = jnp.sum(acc_ref[...]) * _NEG_INV_LOG2
        bits_ref[...] = jnp.full((1, 8, 128), bits, dtype=jnp.float32)


def _bits_kernel(x_ref, loc_ref, inv_s_ref, logc_ref, bits_ref, acc_ref, *,
                 HW, hw_tile, n_inner, any_ragged):
    """Bits-only path: no log_probs writeback (halves HBM traffic)."""
    p = pl.program_id(1)
    t = pl.program_id(2)

    def compute():
        x = x_ref[0].astype(jnp.float32)       # per-tile upcast (bf16-friendly input)
        lp = _log_prob_tile(x, loc_ref[...], inv_s_ref[...], logc_ref[...])
        _accumulate(lp, acc_ref, p * n_inner + t,
                    HW=HW, hw_tile=hw_tile, any_ragged=any_ragged)

    _init_finalize(acc_ref, bits_ref, t, n_inner, compute_lp=compute)


def _bits_lp_kernel(x_ref, loc_ref, inv_s_ref, logc_ref, lp_ref, bits_ref, acc_ref, *,
                    HW, hw_tile, n_inner, any_ragged):
    """draw=True path: also stores lane-dense log_probs tiles."""
    p = pl.program_id(1)
    t = pl.program_id(2)

    def compute():
        x = x_ref[0].astype(jnp.float32)
        lp = _log_prob_tile(x, loc_ref[...], inv_s_ref[...], logc_ref[...])
        lp_ref[0] = lp.astype(lp_ref.dtype)
        _accumulate(lp, acc_ref, p * n_inner + t,
                    HW=HW, hw_tile=hw_tile, any_ragged=any_ragged)

    _init_finalize(acc_ref, bits_ref, t, n_inner, compute_lp=compute)


def continuous_unconditional_entropy_model_forward(
    indexes_nchw, loc, scale, *, draw=False, keep_batch=False, hw_tile=None
):
    """Pallas implementation of ContinuousUnconditionalEntropyModel.forward.

    indexes_nchw: [B, C, H, W] float (NCHW, as in the PyTorch module)
    loc, scale:   [C] per-channel prior parameters
    Returns bits (scalar or [B]); plus log_probs [B, C, H, W] if draw=True.
    """
    B, C, H, W = indexes_nchw.shape
    HW = H * W
    x = indexes_nchw.reshape(B, C, HW)          # no dtype cast here (no extra HBM pass)
    itemsize = jnp.dtype(x.dtype).itemsize
    lp_dtype = x.dtype if jnp.issubdtype(x.dtype, jnp.floating) else jnp.float32

    is_v7x = _is_v7x()
    # Generation-aware block budget: v7x has 64 MiB VMEM (half of v5e/v6e).
    if draw:
        max_block_bytes = (4 << 20) if is_v7x else (8 << 20)
    else:
        max_block_bytes = (6 << 20) if is_v7x else (16 << 20)
    if hw_tile is None:
        hw_tile = _choose_hw_tile(C, HW, itemsize, max_block_bytes)
    num_hw_tiles = -(-HW // hw_tile)
    any_ragged = (num_hw_tiles * hw_tile != HW)

    # Engage the second TensorCore on v7x when the batch axis can't (B == 1).
    n_par = 2 if (is_v7x and B == 1 and num_hw_tiles >= 2
                  and num_hw_tiles % 2 == 0) else 1
    n_inner = num_hw_tiles // n_par
    grid = (B, n_par, n_inner)

    # O(C) wrapper-side prior-parameter prep.
    loc2 = loc.astype(jnp.float32).reshape(C, 1)
    inv_s = (1.0 / scale.astype(jnp.float32))
    logc2 = jnp.log1p(-jnp.exp(-inv_s)).reshape(C, 1)
    inv_s2 = inv_s.reshape(C, 1)

    x_map = lambda b, p, t: (b, 0, p * n_inner + t)
    in_specs = [
        pl.BlockSpec((1, C, hw_tile), x_map),
        pl.BlockSpec((C, 1), lambda b, p, t: (0, 0)),
        pl.BlockSpec((C, 1), lambda b, p, t: (0, 0)),
        pl.BlockSpec((C, 1), lambda b, p, t: (0, 0)),
    ]
    bits_spec = pl.BlockSpec((1, 8, 128), lambda b, p, t: (b * n_par + p, 0, 0))
    bits_shape = jax.ShapeDtypeStruct((B * n_par, 8, 128), jnp.float32)
    scratch = [pltpu.VMEM((1, hw_tile), jnp.float32)]

    # VMEM budget (accounts for sublane/lane padding) -> explicit scoped limit.
    c_rows = _round_up(C, 8)
    lane_pad = _round_up(hw_tile, 128) if hw_tile % 128 else hw_tile
    in_block_vmem = c_rows * lane_pad * itemsize
    out_block_vmem = c_rows * lane_pad * jnp.dtype(lp_dtype).itemsize if draw else 0
    need = 2 * in_block_vmem + 2 * out_block_vmem + lane_pad * 4 + (2 << 20)
    cap = (48 << 20) if is_v7x else (100 << 20)
    cparams = pltpu.CompilerParams(
        dimension_semantics=("parallel", "parallel", "arbitrary"),
        vmem_limit_bytes=int(min(max(need, 16 << 20), cap)),
    )

    n_elem = B * C * HW
    cost = pl.CostEstimate(
        flops=12 * n_elem,
        transcendentals=3 * n_elem,
        bytes_accessed=int(n_elem * itemsize
                           + (n_elem * jnp.dtype(lp_dtype).itemsize if draw else 0)
                           + B * n_par * 8 * 128 * 4 + 3 * C * 4),
    )

    kern_kwargs = dict(HW=HW, hw_tile=hw_tile, n_inner=n_inner, any_ragged=any_ragged)

    if draw:
        lp_full, bits_tile = pl.pallas_call(
            functools.partial(_bits_lp_kernel, **kern_kwargs),
            out_shape=(jax.ShapeDtypeStruct((B, C, HW), lp_dtype), bits_shape),
            grid_spec=pltpu.PrefetchScalarGridSpec(
                num_scalar_prefetch=0,
                grid=grid,
                in_specs=in_specs,
                out_specs=[pl.BlockSpec((1, C, hw_tile), x_map), bits_spec],
                scratch_shapes=scratch),
            compiler_params=cparams,
            cost_estimate=cost,
        )(x, loc2, inv_s2, logc2)
        log_probs = lp_full.reshape(B, C, H, W)
    else:
        bits_tile = pl.pallas_call(
            functools.partial(_bits_kernel, **kern_kwargs),
            out_shape=bits_shape,
            grid_spec=pltpu.PrefetchScalarGridSpec(
                num_scalar_prefetch=0,
                grid=grid,
                in_specs=in_specs,
                out_specs=bits_spec,
                scratch_shapes=scratch),
            compiler_params=cparams,
            cost_estimate=cost,
        )(x, loc2, inv_s2, logc2)

    bits_per_batch = jnp.sum(bits_tile[:, 0, 0].reshape(B, n_par), axis=1)   # [B]
    bits = bits_per_batch if keep_batch else jnp.sum(bits_per_batch)
    if draw:
        return bits, log_probs
    return bits


def _reference_forward(indexes_nchw, loc, scale, *, keep_batch=False, draw=False):
    """Plain-JAX reference using the (un-fused) two-softplus formulation."""
    x = indexes_nchw.astype(jnp.float32)
    loc_b = loc.reshape(1, -1, 1, 1).astype(jnp.float32)
    inv_s = (1.0 / scale.astype(jnp.float32)).reshape(1, -1, 1, 1)
    logc = jnp.log1p(-jnp.exp(-inv_s))
    u = (x + 0.5 - loc_b) * inv_s
    l = (x - 0.5 - loc_b) * inv_s
    sp = lambda z: jnp.maximum(z, 0.0) + jnp.log(1.0 + jnp.exp(-jnp.abs(z)))
    lp = logc - sp(-u) - sp(l)
    if keep_batch:
        bits = jnp.sum(lp, axis=(1, 2, 3)) * _NEG_INV_LOG2
    else:
        bits = jnp.sum(lp) * _NEG_INV_LOG2
    if draw:
        return bits, lp
    return bits


if __name__ == "__main__":
    B, C, H, W = 2, 4, 16, 16

    key = jax.random.PRNGKey(0)
    k_x, _ = jax.random.split(key)
    # quantized latents ("indexes"): rounded gaussians, float32, NCHW
    indexes = jnp.round(3.0 * jax.random.normal(k_x, (B, C, H, W), dtype=jnp.float32))

    # deterministic synthetic per-channel prior parameters
    loc = jnp.linspace(-0.5, 0.5, C, dtype=jnp.float32)
    scale = jnp.linspace(0.75, 2.0, C, dtype=jnp.float32)

    bits, log_probs = continuous_unconditional_entropy_model_forward(
        indexes, loc, scale, draw=True, keep_batch=False
    )
    bits_only = continuous_unconditional_entropy_model_forward(
        indexes, loc, scale, draw=False, keep_batch=False
    )
    bits_kb = continuous_unconditional_entropy_model_forward(
        indexes, loc, scale, draw=False, keep_batch=True
    )
    jax.block_until_ready((bits, log_probs, bits_only, bits_kb))

    ref_bits, ref_lp = _reference_forward(indexes, loc, scale, keep_batch=False, draw=True)
    ref_kb = _reference_forward(indexes, loc, scale, keep_batch=True)

    assert log_probs.shape == (B, C, H, W)
    assert jnp.allclose(log_probs, ref_lp, rtol=1e-4, atol=1e-3), "log_probs mismatch"
    assert jnp.allclose(bits, ref_bits, rtol=1e-4, atol=1e-2), (bits, ref_bits)
    assert jnp.allclose(bits_only, ref_bits, rtol=1e-4, atol=1e-2), (bits_only, ref_bits)
    assert jnp.allclose(bits_kb, ref_kb, rtol=1e-4, atol=1e-2), (bits_kb, ref_kb)

    print("KERNEL_OK")
</pallas_src>

<mosaic_0001>
module attributes {stable_mosaic.version = 11 : i64} {
  func.func @_bits_lp_kernel(%arg0: i32, %arg1: i32, %arg2: i32, %arg3: memref<1x4x256xf32, #tpu.memory_space<vmem>>, %arg4: memref<4x1xf32, #tpu.memory_space<vmem>>, %arg5: memref<4x1xf32, #tpu.memory_space<vmem>>, %arg6: memref<4x1xf32, #tpu.memory_space<vmem>>, %arg7: memref<1x4x256xf32, #tpu.memory_space<vmem>>, %arg8: memref<1x8x128xf32, #tpu.memory_space<vmem>>, %arg9: memref<1x256xf32, #tpu.memory_space<vmem>>) attributes {dimension_semantics = [#tpu.dimension_semantics<parallel>, #tpu.dimension_semantics<parallel>, #tpu.dimension_semantics<arbitrary>], iteration_bounds = array<i64: 2, 1, 1>, scalar_prefetch = 0 : i64, scratch_operands = 1 : i64, tpu.core_type = #tpu.core_type<tc>, window_params = [{transform_indices = @transform_0, window_bounds = array<i64: 1, 4, 256>}, {pipeline_mode = #tpu.pipeline_mode<synchronous>, transform_indices = @transform_1, window_bounds = array<i64: 4, 1>}, {pipeline_mode = #tpu.pipeline_mode<synchronous>, transform_indices = @transform_2, window_bounds = array<i64: 4, 1>}, {pipeline_mode = #tpu.pipeline_mode<synchronous>, transform_indices = @transform_3, window_bounds = array<i64: 4, 1>}, {transform_indices = @transform_4, window_bounds = array<i64: 1, 4, 256>}, {transform_indices = @transform_5, window_bounds = array<i64: 1, 8, 128>}]} {
    %c0_i32 = arith.constant 0 : i32
    %0 = arith.cmpi eq, %arg2, %c0_i32 : i32
    %1 = arith.extui %0 : i1 to i32
    %c0_i32_0 = arith.constant 0 : i32
    %2 = arith.cmpi ne, %1, %c0_i32_0 : i32
    scf.if %2 {
      %cst_26 = arith.constant 0.000000e+00 : f32
      %51 = vector.broadcast %cst_26 : f32 to vector<1x256xf32>
      %c0_27 = arith.constant 0 : index
      %c0_28 = arith.constant 0 : index
      %52 = vector.load %arg9[%c0_27, %c0_28] : memref<1x256xf32, #tpu.memory_space<vmem>>, vector<1x256xf32>
      tpu.vector_store %arg9[%c0_27, %c0_28], %51 {strides = array<i32>} : memref<1x256xf32, #tpu.memory_space<vmem>>, vector<1x256xf32>,
    } else {
    }
    %c0 = arith.constant 0 : index
    %c0_1 = arith.constant 0 : index
    %c0_2 = arith.constant 0 : index
    %3 = vector.load %arg3[%c0, %c0_1, %c0_2] : memref<1x4x256xf32, #tpu.memory_space<vmem>>, vector<1x4x256xf32>
    %4 = vector.shape_cast %3 : vector<1x4x256xf32> to vector<4x256xf32>
    %c0_3 = arith.constant 0 : index
    %c0_4 = arith.constant 0 : index
    %5 = vector.load %arg4[%c0_3, %c0_4] : memref<4x1xf32, #tpu.memory_space<vmem>>, vector<4x1xf32>
    %c0_5 = arith.constant 0 : index
    %c0_6 = arith.constant 0 : index
    %6 = vector.load %arg5[%c0_5, %c0_6] : memref<4x1xf32, #tpu.memory_space<vmem>>, vector<4x1xf32>
    %c0_7 = arith.constant 0 : index
    %c0_8 = arith.constant 0 : index
    %7 = vector.load %arg6[%c0_7, %c0_8] : memref<4x1xf32, #tpu.memory_space<vmem>>, vector<4x1xf32>
    %cst = arith.constant 5.000000e-01 : f32
    %8 = vector.broadcast %cst : f32 to vector<4x256xf32>
    %9 = arith.addf %4, %8 : vector<4x256xf32>
    %10 = vector.broadcast %5 : vector<4x1xf32> to vector<4x256xf32>
    %11 = arith.subf %9, %10 : vector<4x256xf32>
    %12 = vector.broadcast %6 : vector<4x1xf32> to vector<4x256xf32>
    %13 = arith.mulf %11, %12 : vector<4x256xf32>
    %14 = vector.broadcast %6 : vector<4x1xf32> to vector<4x256xf32>
    %15 = arith.subf %13, %14 : vector<4x256xf32>
    %cst_9 = arith.constant 0.000000e+00 : f32
    %16 = vector.broadcast %cst_9 : f32 to vector<4x256xf32>
    %17 = arith.subf %16, %13 : vector<4x256xf32>
    %cst_10 = arith.constant 0.000000e+00 : f32
    %18 = vector.broadcast %cst_10 : f32 to vector<4x256xf32>
    %19 = arith.maximumf %17, %18 : vector<4x256xf32>
    %cst_11 = arith.constant 0.000000e+00 : f32
    %20 = vector.broadcast %cst_11 : f32 to vector<4x256xf32>
    %21 = arith.maximumf %15, %20 : vector<4x256xf32>
    %22 = arith.addf %19, %21 : vector<4x256xf32>
    %23 = math.absf %13 : vector<4x256xf32>
    %cst_12 = arith.constant 0.000000e+00 : f32
    %24 = vector.broadcast %cst_12 : f32 to vector<4x256xf32>
    %25 = arith.subf %24, %23 : vector<4x256xf32>
    %26 = math.exp %25 : vector<4x256xf32>
    %cst_13 = arith.constant 1.000000e+00 : f32
    %27 = vector.broadcast %cst_13 : f32 to vector<4x256xf32>
    %28 = arith.addf %27, %26 : vector<4x256xf32>
    %29 = math.absf %15 : vector<4x256xf32>
    %cst_14 = arith.constant 0.000000e+00 : f32
    %30 = vector.broadcast %cst_14 : f32 to vector<4x256xf32>
    %31 = arith.subf %30, %29 : vector<4x256xf32>
    %32 = math.exp %31 : vector<4x256xf32>
    %cst_15 = arith.constant 1.000000e+00 : f32
    %33 = vector.broadcast %cst_15 : f32 to vector<4x256xf32>
    %34 = arith.addf %33, %32 : vector<4x256xf32>
    %35 = arith.mulf %28, %34 : vector<4x256xf32>
    %36 = math.log %35 : vector<4x256xf32>
    %37 = arith.addf %22, %36 : vector<4x256xf32>
    %38 = vector.broadcast %7 : vector<4x1xf32> to vector<4x256xf32>
    %39 = arith.subf %38, %37 : vector<4x256xf32>
    %c0_16 = arith.constant 0 : index
    %c0_17 = arith.constant 0 : index
    %c0_18 = arith.constant 0 : index
    %40 = vector.load %arg7[%c0_16, %c0_17, %c0_18] : memref<1x4x256xf32, #tpu.memory_space<vmem>>, vector<1x4x256xf32>
    %41 = vector.shape_cast %40 : vector<1x4x256xf32> to vector<4x256xf32>
    %42 = vector.shape_cast %39 : vector<4x256xf32> to vector<1x4x256xf32>
    tpu.vector_store %arg7[%c0_16, %c0_17, %c0_18], %42 {strides = array<i32>} : memref<1x4x256xf32, #tpu.memory_space<vmem>>, vector<1x4x256xf32>,
    %c0_19 = arith.constant 0 : index
    %c0_20 = arith.constant 0 : index
    %43 = vector.load %arg9[%c0_19, %c0_20] : memref<1x256xf32, #tpu.memory_space<vmem>>, vector<1x256xf32>
    %cst_21 = arith.constant dense<0.000000e+00> : vector<256xf32>
    %44 = vector.multi_reduction <add>, %39, %cst_21 [0] : vector<4x256xf32> to vector<256xf32>
    %45 = vector.shape_cast %44 : vector<256xf32> to vector<1x256xf32>
    %46 = arith.addf %43, %45 : vector<1x256xf32>
    %c0_22 = arith.constant 0 : index
    %c0_23 = arith.constant 0 : index
    %47 = vector.load %arg9[%c0_22, %c0_23] : memref<1x256xf32, #tpu.memory_space<vmem>>, vector<1x256xf32>
    tpu.vector_store %arg9[%c0_22, %c0_23], %46 {strides = array<i32>} : memref<1x256xf32, #tpu.memory_space<vmem>>, vector<1x256xf32>,
    %c0_i32_24 = arith.constant 0 : i32
    %48 = arith.cmpi eq, %arg2, %c0_i32_24 : i32
    %49 = arith.extui %48 : i1 to i32
    %c0_i32_25 = arith.constant 0 : i32
    %50 = arith.cmpi ne, %49, %c0_i32_25 : i32
    scf.if %50 {
      %c0_26 = arith.constant 0 : index
      %c0_27 = arith.constant 0 : index
      %51 = vector.load %arg9[%c0_26, %c0_27] : memref<1x256xf32, #tpu.memory_space<vmem>>, vector<1x256xf32>
      %52 = vector.shape_cast %51 : vector<1x256xf32> to vector<1x1x256xf32>
      %cst_28 = arith.constant dense<0.000000e+00> : vector<1xf32>
      %53 = vector.multi_reduction <add>, %52, %cst_28 [1, 2] : vector<1x1x256xf32> to vector<1xf32>
      %54 = vector.shape_cast %53 : vector<1xf32> to vector<1x1x1xf32>
      %55 = vector.extract %54[0, 0, 0] : f32 from vector<1x1x1xf32>
      %cst_29 = arith.constant -1.44269502 : f32
      %56 = arith.mulf %55, %cst_29 : f32
      %57 = vector.broadcast %56 : f32 to vector<1x8x128xf32>
      %c0_30 = arith.constant 0 : index
      %c0_31 = arith.constant 0 : index
      %c0_32 = arith.constant 0 : index
      %58 = vector.load %arg8[%c0_30, %c0_31, %c0_32] : memref<1x8x128xf32, #tpu.memory_space<vmem>>, vector<1x8x128xf32>
      tpu.vector_store %arg8[%c0_30, %c0_31, %c0_32], %57 {strides = array<i32>} : memref<1x8x128xf32, #tpu.memory_space<vmem>>, vector<1x8x128xf32>,
    } else {
    }
    return
  }
  func.func @transform_0(%arg0: i32, %arg1: i32, %arg2: i32) -> (i32, i32, i32) {
    %c1_i32 = arith.constant 1 : i32
    %0 = arith.muli %arg1, %c1_i32 : i32
    %1 = arith.addi %0, %arg2 : i32
    %c0_i32 = arith.constant 0 : i32
    %c0_i32_0 = arith.constant 0 : i32
    return %arg0, %c0_i32, %1 : i32, i32, i32
  }
  func.func @transform_1(%arg0: i32, %arg1: i32, %arg2: i32) -> (i32, i32) {
    %c0_i32 = arith.constant 0 : i32
    %c0_i32_0 = arith.constant 0 : i32
    %c0_i32_1 = arith.constant 0 : i32
    return %c0_i32, %c0_i32_0 : i32, i32
  }
  func.func @transform_2(%arg0: i32, %arg1: i32, %arg2: i32) -> (i32, i32) {
    %c0_i32 = arith.constant 0 : i32
    %c0_i32_0 = arith.constant 0 : i32
    %c0_i32_1 = arith.constant 0 : i32
    return %c0_i32, %c0_i32_0 : i32, i32
  }
  func.func @transform_3(%arg0: i32, %arg1: i32, %arg2: i32) -> (i32, i32) {
    %c0_i32 = arith.constant 0 : i32
    %c0_i32_0 = arith.constant 0 : i32
    %c0_i32_1 = arith.constant 0 : i32
    return %c0_i32, %c0_i32_0 : i32, i32
  }
  func.func @transform_4(%arg0: i32, %arg1: i32, %arg2: i32) -> (i32, i32, i32) {
    %c1_i32 = arith.constant 1 : i32
    %0 = arith.muli %arg1, %c1_i32 : i32
    %1 = arith.addi %0, %arg2 : i32
    %c0_i32 = arith.constant 0 : i32
    %c0_i32_0 = arith.constant 0 : i32
    return %arg0, %c0_i32, %1 : i32, i32, i32
  }
  func.func @transform_5(%arg0: i32, %arg1: i32, %arg2: i32) -> (i32, i32, i32) {
    %c1_i32 = arith.constant 1 : i32
    %0 = arith.muli %arg0, %c1_i32 : i32
    %1 = arith.addi %0, %arg1 : i32
    %c0_i32 = arith.constant 0 : i32
    %c0_i32_0 = arith.constant 0 : i32
    %c0_i32_1 = arith.constant 0 : i32
    return %1, %c0_i32, %c0_i32_0 : i32, i32, i32
  }
}

</mosaic_0001>

<bundles_post_ra>
// kernel: tpu_custom_call.1
= control target key start
LH: loop header
LB: loop body
LE: loop exit
PB: predicated region body
PF: predicated region fallthrough
CT: control target
= control target key end

     0   :  { %s1013_s0 = inlined_call_operand.hbm [shape: f32[2,4,256], index: 0, kind: input, shape index: {}]   ;;  %s1014_s1 = inlined_call_operand.vmem [shape: f32[4,1], index: 1, kind: input, shape index: {}]   ;;  %s1015_s2 = inlined_call_operand.vmem [shape: f32[4,1], index: 2, kind: input, shape index: {}]   ;;  %s1016_s3 = inlined_call_operand.vmem [shape: f32[4,1], index: 3, kind: input, shape index: {}]   ;;  %s1017_s4 = inlined_call_operand.hbm [shape: f32[2,4,256], index: 4, kind: output, shape index: {0}]   ;;  %s1018_s5 = inlined_call_operand.hbm [shape: f32[2,8,128], index: 5, kind: output, shape index: {1}]  }
   0x1   :  { %1019 = sst [smem:[#allocation12_spill]] %s1013_s0 }
   0x2   :  { %11 = vsyncpa [#allocation4], 0 }
   0x3   :  { %13 = vsyncpa [#allocation4 + $0x1], 0 }
   0x4   :  { %14 = vsyncpa [#allocation5], 0 }
   0x5   :  { %16 = vsyncpa [#allocation5 + $0x1], 0 }
   0x6   :  { %17 = vsyncpa [#allocation8], 0 }
   0x7   :  { %19 = vsyncpa [#allocation8 + $0x1], 0  ;;  %s857_s18 = smov 0   ;;  %s859_s19 = smov 0  }
   0x8   :  { %s861_s20 = smov 0   ;;  %s863_s21 = smov 0  }
   0x9   :  { %s865_s22 = smov 0   ;;  %s867_s23 = smov 0  }
   0xa LB: > { %s578_s24 = sadd.s32 4294967295, %s822_s23   ;;  %s579_s25 = sadd.s32 4294967294, %s822_s23   ;;  %s822_s23 = sphi %s867_s23, %s25_s23   ;;  %s818_s22 = sphi %s865_s22, %s1031_s22   ;;  %s814_s21 = sphi %s863_s21, %s1030_s21   ;;  %s810_s20 = sphi %s861_s20, %s1029_s20   ;;  %s806_s19 = sphi %s859_s19, %s1028_s19   ;;  %s802_s18 = sphi %s857_s18, %s1027_s18  }
   0xb   : > { %s44_s26 = sadd.s32 1, %s818_s22  ;;  %s55_s27 = sadd.s32 1, %s810_s20 }
   0xc   : > { %p46_p0 = scmp.ge.s32.totalorder %s44_s26, 2  ;;  %p62_p1 = scmp.ne.s32.totalorder %s810_s20, %s806_s19 }
   0xd   : > { %p63_p2 = scmp.eq.s32.totalorder %s822_s23, 0  ;;  %p68_p3 = scmp.ne.s32.totalorder %s806_s19, %s802_s18 }
   0xe   : > { %s1033_s26 = smov (%p46_p0, %s44_s26), 0  ;;  %p69_p5 = scmp.eq.s32.totalorder %s578_s24, 0 }
   0xf   : > { %p898_p4 = por %p63_p2, %p62_p1  ;;  %s50_s29 = ssub.s32 %s818_s22, %s1033_s26 }
  0x10   : > { %p159_p6 = scmp.eq.s32.totalorder %s578_s24, 1  ;;  %p53_p7 = scmp.eq.s32.totalorder %s50_s29, 0 }
  0x11   : > { %p904_p8 = por %p69_p5, %p68_p3  ;;  %p165_p10 = scmp.eq.s32.totalorder %s579_s25, 1 }
  0x12   : > { %p908_p9 = por %p159_p6, %p62_p1  ;;  %p581_p12 = scmp.ge.s32.totalorder %s822_s23, 2 }
  0x13   : > { %s913_s7 = scalar_select %p53_p7, %s810_s20, %s55_s27  }
  0x14   : > { %p915_p11 = por %p165_p10, %p68_p3  ;;  %p617_p13 = scmp.lt.s32.totalorder %s822_s23, 2 }
  0x15   : > { %s222_s9 = sand.u32 1, %s810_s20   ;;  %s596_s11 = sshll.u32 %s818_s22, 3 }
  0x16   : > { %s582_s10 = sshll.u32 %s222_s9, 3  ;;  %s1024_s0 = sld [smem:[#allocation12_spill]] }
  0x17   : > { %s226_s15 = scalar_lea.vmem [#allocation3], %s582_s10  ;;  %p607_p0 = pnand %p617_p13, %p898_p4 }
  0x18   : > { %s238_s16 = sshll.u32 %s226_s15, 4  ;;  %p585_p1 = scmp.ge.s32.totalorder %s822_s23, 1  ;;  %s239_s16 = int_to_ptr.vmem [resolvable:$true] %s238_s16 }
  0x19   : > { %p243_p2 = scmp.lt.s32.totalorder %s822_s23, 3  ;;  %s223_s24 = scalar_lea.sflag [#allocation4], %s222_s9 }
  0x1b   : > { %p244_p3 = pnand %p585_p1, %p243_p2 }
  0x1c   : > { %s234_s14 = scalar_lea.hbm %s1024_s0, %s596_s11  ;;  %s931_s25 = sand.u32 (!%p244_p3), 1, %s806_s19  }
  0x1d   : > { %s236_s17 = sshll.u32 %s234_s14, 4  ;;  %247 = sbr.rel (%p244_p3) target bundleno = 419 (0x1a3), region = 36  ;;  %s237_s17 = int_to_ptr.hbm [resolvable:$true] %s236_s17 }
  0x1e   : > { %609 = dma.hbm_to_vmem [thread:$0]  (!%p607_p0), %s237_s17, 128, %s239_s16, %s223_s24  }
  0x1f   : > { %s934_s27 = sshll.u32 (!%p244_p3), %s931_s25, 3  ;;  %s250_s29 = scalar_lea.sflag (!%p244_p3), [#allocation4], %s931_s25 }
  0x20   : > { %s253_s10 = scalar_lea.vmem (!%p244_p3), [#allocation3], %s934_s27 }
  0x22   : > { %789 = dma.done.wait (%p904_p8), %s250_s29, 128  }
  0x23   : > { %791 = vsyncadd (%p904_p8), %s250_s29, 4294967168  ;;  %v824_v0 = vmov 0   ;;  %v301_v1 = vld [vmem:[%s1014_s1] sm:$0xf]  ;;  %v825_v4 = vmov 839922192   ;;  %v295_v23 = vlaneseq }
  0x24   : > { %670 = vset.pattern.permute.xlu0 %v824_v0  ;;  %671 = vset.pattern.permute.xlu1 %v824_v0  ;;  %v303_v2 = vld [vmem:[%s1016_s3] sm:$0xf]  ;;  %v310_v5 = vunpack.c.l.s4 %v825_v4  ;;  %v300_v8 = vld [vmem:[%s253_s10] sm:$0xff]  ;;  %v826_v28 = vmov 0.0   ;;  %vm360_vm1 = vcmask 1043456   ;;  %s278_s30 = scalar_lea.vmem [#allocation6], %s934_s27 }
  0x25   : > { %307 = vperm.xlu0 %670, %v301_v1   ;;  %346 = vperm.xlu1 %671, %v303_v2   ;;  %v302_v3 = vld [vmem:[%s1015_s2] sm:$0xf]  ;;  %v304_v9 = vadd.f32 0.5, %v300_v8  ;;  %vm951_vm0 = vcmp.lt.s32.totalorder %v295_v23, 256  ;;  %vm382_vm2 = vcmask 1040384   ;;  %s597_s15 = sshll.u32 %s814_s21, 3 }
  0x26   : > { %v311_v7 = vunpack.c.0.s8 %v310_v5  ;;  %299 = vst.msk [vmem:[#allocation2] sm:$0x3] %vm951_vm0, %v826_v28  ;;  %s435_s24 = scalar_lea.hbm %s1017_s4, %s597_s15  ;;  %s437_s29 = sshll.u32 %s278_s30, 4  ;;  %s438_s29 = int_to_ptr.vmem [resolvable:$true] %s437_s29 }
  0x27   : > { %s439_s10 = sshll.u32 %s435_s24, 4  ;;  %s416_s28 = scalar_lea.sflag [#allocation5], %s931_s25  ;;  %s440_s10 = int_to_ptr.hbm [resolvable:$true] %s439_s10 }
  0x28   : > { %s722_s9 = sshra.s32 %s440_s10, 4  ;;  %s728_s21 = scalar_lea.hbm %s1017_s4, 16  ;;  %s723_s9 = int_to_ptr.hbm [resolvable:$true] %s722_s9 }
  0x29   : > { %s724_s11 = scalar_lea.hbm %s723_s9, 8  ;;  %p729_p7 = scmp.lt.s32.totalorder %s723_s9, %s1017_s4 }
  0x2a   : > { %p725_p4 = scmp.ne.s32.totalorder %s723_s9, %s724_s11  ;;  %p730_p8 = scmp.lt.s32.totalorder %s728_s21, %s724_s11 }
  0x2c   : > { %p726_p5 = pnand %p725_p4, %p908_p9  ;;  %p731_p10 = por %p730_p8, %p729_p7 }
  0x2d   : > { %317 = vperm.xlu0 %670, %v302_v3   ;;  %v364_v59 = vld [vmem:[#allocation2] sm:$0x3] }
  0x2e   : > { %p727_p6 = pneg %p726_p5 }
  0x30   : > { %p732_p13 = pnand %p731_p10, %p727_p6 }
  0x97   : > { %v308_v6 = vpop.permute.xlu0 %307  ;;  %v347_v37 = vpop.permute.xlu1 %346 }
  0x98   : > { %v312_v10 = vperm.slane %v308_v6, %v311_v7 }
  0x9a   : > { %v314_v12 = vsub.f32 %v304_v9, %v312_v10 }
  0x9f   : > { %v318_v11 = vpop.permute.xlu0 %317 }
  0xa0   : > { %v322_v13 = vperm.slane %v318_v11, %v311_v7 }
  0xa2   : > { %v324_v14 = vmul.f32 %v322_v13, %v314_v12 }
  0xa4   : > { %v325_v15 = vsub.f32 %v324_v14, %v322_v13  ;;  %v330_v16 = vand.u32 2147483647, %v324_v14  ;;  %v326_v30 = vsub.f32 0.0, %v324_v14 }
  0xa6   : > { %v331_v17 = vsub.f32 0.0, %v330_v16  ;;  %v335_v18 = vand.u32 2147483647, %v325_v15  ;;  %v327_v31 = vmax.f32 %v326_v30, 0.0  ;;  %v328_v32 = vmax.f32 %v325_v15, 0.0 }
  0xa8   : > { %v332_v19 = vmul.f32 1.442695, %v331_v17  ;;  %v336_v20 = vsub.f32 0.0, %v335_v18  ;;  %v329_v34 = vadd.f32 %v328_v32, %v327_v31 }
  0xaa   : > { %672 = vpow2.f32 %v332_v19  ;;  %v337_v21 = vmul.f32 1.442695, %v336_v20 }
  0xac   : > { %674 = vpow2.f32 %v337_v21 }
  0xb0   : > { %v673_v22 = vpop.eup %672 }
  0xb1   : > { %v334_v25 = vadd.f32 1.0, %v673_v22 }
  0xb2   : > { %v675_v24 = vpop.eup %674 }
  0xb3   : > { %v339_v26 = vadd.f32 1.0, %v675_v24 }
  0xb5   : > { %v340_v29 = vmul.f32 %v339_v26, %v334_v25 }
  0xb7   : > { %676 = vlog2.f32 %v340_v29 }
  0xbd   : > { %v677_v33 = vpop.eup %676 }
  0xbe   : > { %v342_v35 = vmul.f32 0.6931472, %v677_v33 }
  0xc0   : > { %v343_v36 = vadd.f32 %v342_v35, %v329_v34 }
  0xc2   : > { %350 = vst [vmem:[#allocation1] ss:$2 sm:$0xff] %v343_v36 }
  0xc9   : > { %v351_v38 = vld.sshfl [vmem:[#allocation1] sm:$0xff pattern:$0x75316420]  ;;  %v352_v39 = vld.sshfl [vmem:[#allocation1 + $0x8] sm:$0xff pattern:$0x75316420] }
  0xca   : > { %v355_v40 = vsub.f32 %v347_v37, %v351_v38  ;;  %v356_v41 = vsub.f32 %v347_v37, %v352_v39 }
  0xcc   : > { %v359_v42 = vrot.slane %v356_v41, 4  ;;  %v365_v43 = vsel %vm360_vm1, %v355_v40, 0.0  ;;  %v372_v44 = vsel %vm360_vm1, %v356_v41, 0.0 }
  0xcd   : > { %v366_v45 = vrot.slane %v365_v43, 4  ;;  %v373_v46 = vrot.slane %v372_v44, 4 }
  0xce   : > { %v361_v47 = vsel %vm360_vm1, %v355_v40, %v359_v42 }
  0xcf   : > { %v367_v48 = vadd.f32 %v366_v45, %v365_v43  ;;  %v374_v49 = vadd.f32 %v373_v46, %v372_v44  ;;  %363 = vst [vmem:[%s278_s30] sm:$0xff] %v361_v47 }
  0xd1   : > { %v368_v50 = vrot.slane %v367_v48, 2  ;;  %v375_v51 = vrot.slane %v374_v49, 2 }
  0xd3   : > { %v369_v52 = vadd.f32 %v368_v50, %v367_v48  ;;  %v376_v53 = vadd.f32 %v375_v51, %v374_v49 }
  0xd5   : > { %v370_v54 = vrot.slane %v369_v52, 1  ;;  %v377_v55 = vrot.slane %v376_v53, 1 }
  0xd7   : > { %v378_v56 = vadd.f32 %v377_v55, %v376_v53  ;;  %v371_v57 = vadd.f32 %v370_v54, %v369_v52 }
  0xd9   : > { %v381_v58 = vrot.slane %v378_v56, 7 }
  0xdb   : > { %v383_v60 = vsel %vm382_vm2, %v371_v57, %v381_v58 }
  0xdc   : > { %v385_v61 = vadd.f32 %v383_v60, %v364_v59 }
  0xde   : > { %390 = vst.msk [vmem:[#allocation2] sm:$0x3] %vm951_vm0, %v385_v61 }
  0xe5   : > { %v394_v62 = vld [vmem:[#allocation2] sm:$0x3] }
  0xe6   : > { %v396_v63 = vperm.slane %v394_v62, 0  ;;  %v397_v0 = vperm.slane %v394_v62, 1 }
  0xe8   : > { %v400_v1 = vsel %vm382_vm2, %v396_v63, 0.0  ;;  %v401_v2 = vsel %vm382_vm2, %v397_v0, 0.0 }
  0xe9   : > { %v402_v3 = vadd.f32 %v401_v2, %v400_v1 }
  0xeb   : > { %403 = vadd.xlane.f32.xlu1 %v402_v3 }
  0xec   : > { %735 = shalt.err (!%p732_p13)
}
  0xed   : > { %602 = dma.vmem_to_hbm [thread:$0]  (%p908_p9), %s438_s29, 128, %s440_s10, %s416_s28  }
  0xee   : > { %s450_s16 = scalar_lea.hbm %s1018_s5, %s597_s15  ;;  %s285_s17 = scalar_lea.vmem [#allocation7], %s934_s27 }
  0xef   : > { %s452_s24 = sshll.u32 %s285_s17, 4  ;;  %s454_s9 = sshll.u32 %s450_s16, 4  ;;  %s453_s24 = int_to_ptr.vmem [resolvable:$true] %s452_s24  ;;  %s455_s9 = int_to_ptr.hbm [resolvable:$true] %s454_s9 }
  0xf0   : > { %s421_s29 = scalar_lea.sflag [#allocation8], %s931_s25  ;;  %s750_s10 = sshra.s32 %s455_s9, 4  ;;  %s751_s10 = int_to_ptr.hbm [resolvable:$true] %s750_s10 }
  0xf1   : > { %s752_s28 = scalar_lea.hbm %s751_s10, 8  ;;  %s756_s27 = scalar_lea.hbm %s1018_s5, 16 }
  0xf2   : > { %p753_p0 = scmp.ne.s32.totalorder %s751_s10, %s752_s28  ;;  %p757_p3 = scmp.lt.s32.totalorder %s751_s10, %s1018_s5 }
  0xf3   : > { %p758_p4 = scmp.lt.s32.totalorder %s756_s27, %s752_s28 }
  0xf4   : > { %p754_p1 = pnand %p753_p0, %p908_p9 }
  0xf5   : > { %p759_p5 = por %p758_p4, %p757_p3 }
  0xf6   : > { %p755_p2 = pneg %p754_p1 }
  0xf8   : > { %p760_p6 = pnand %p759_p5, %p755_p2 }
 0x15e   : > { %v404_v4 = vpop.xlane.xlu1 %403 }
 0x15f   : > { %v405_v5 = vrot.slane %v404_v4, 4 }
 0x161   : > { %v406_v6 = vadd.f32 %v405_v5, %v404_v4 }
 0x163   : > { %v407_v7 = vrot.slane %v406_v6, 2 }
 0x165   : > { %v408_v8 = vadd.f32 %v407_v7, %v406_v6 }
 0x167   : > { %v409_v9 = vrot.slane %v408_v8, 1 }
 0x169   : > { %v410_v10 = vadd.f32 %v409_v9, %v408_v8 }
 0x16b   : > { %598 = vpush %v410_v10 }
 0x19c   : > { %s599_s11 = spop %598 }
 0x19d   : > { %s412_s12 = smul.f32 -1.442695, %s599_s11 }
 0x19f   : > { %v413_v11 = vstv %s412_s12 }
 0x1a0   : > { %414 = vst [vmem:[%s285_s17] sm:$0xff] %v413_v11 }
 0x1a1   : > { %763 = shalt.err (!%p760_p6)
}
 0x1a2   : > { %603 = dma.vmem_to_hbm [thread:$0]  (%p908_p9), %s453_s24, 128, %s455_s9, %s421_s29  }
 0x1a3 PF: > { %s466_s25 = sand.u32 1, %s802_s18   ;;  %p611_p7 = pnand %p581_p12, %p915_p11 }
 0x1a4   : > { %s467_s30 = scalar_lea.sflag [#allocation5], %s466_s25 }
 0x1a5   : > { %p612_p8 = pneg %p611_p7 }
 0x1a7   : > { %793 = dma.done.wait (%p612_p8), %s467_s30, 128  }
 0x1a8   : > { %795 = vsyncadd (%p612_p8), %s467_s30, 4294967168  ;;  %s477_s0 = scalar_lea.sflag [#allocation8], %s466_s25 }
 0x1a9   : > { %797 = dma.done.wait (%p612_p8), %s477_s0, 128  }
 0x1aa   : > { %799 = vsyncadd (%p612_p8), %s477_s0, 4294967168  ;;  %s25_s23 = sadd.s32 1, %s822_s23   ;;  %s1027_s18 = smov %s806_s19 }
 0x1ab   : > { %p22_p10 = scmp.ge.s32.totalorder %s25_s23, 4   ;;  %s1028_s19 = smov %s810_s20 }
 0x1ac   : > { %s1029_s20 = smov %s913_s7  ;;  %s1030_s21 = smov %s818_s22 }
 0x1ad   : > { %s1031_s22 = smov %s1033_s26  ;;  %24 = sbr.rel (!%p22_p10) target bundleno = 10 (0xa), region = 106 }
 0x1b2   :  { %483 = vsyncpa [#allocation4], 1 }
 0x1b3   :  { %485 = vsyncpa [#allocation4 + $0x1], 1 }
 0x1b4   :  { %486 = vsyncpa [#allocation5], 1 }
 0x1b5   :  { %488 = vsyncpa [#allocation5 + $0x1], 1 }
 0x1b6   :  { %489 = vsyncpa [#allocation8], 1 }
 0x1b7   :  { %491 = vsyncpa [#allocation8 + $0x1], 1 }

</bundles_post_ra>
